<compile_context>
chip_gen: v6e
topology: v6e:2x2x1
jax: 0.10.0
libtpu: 0.0.40
codegen_flags: <defaults>
</compile_context>

<pallas_src>
import jax
import jax.numpy as jnp
from jax.experimental import pallas as pl
from jax.experimental.pallas import tpu as pltpu


def _round_up(n, m):
    return ((n + m - 1) // m) * m


def _critic_kernel(x_ref, w_ref, b_ref, v_ref):
    # x_ref: (TB, D) f32 VMEM tile (pipelined over the batch grid)
    # w_ref: (1, D)  f32 VMEM, resident across the grid (constant index_map)
    # b_ref: (1, 1)  f32 SMEM scalar
    # v_ref: (TB, 1) f32 output tile
    x = x_ref[...]
    w = w_ref[...]                                 # broadcast over rows (VPU)
    v = jnp.sum(x * w, axis=-1, keepdims=True)     # VPU mul + XLU lane reduce
    v_ref[...] = v + b_ref[0, 0]                   # scalar bias from SMEM


def fold_critic_params(w1, b1, w2, b2):
    """Fold out_enc and v_out into one row vector + scalar bias.

    Valid because the reference forward has no nonlinearity between the two
    Linears.  Call once per parameter update, NOT per forward.
    Note: folding changes f32 summation order vs. the two-layer reference;
    with D=48, H=32 the difference is well inside 1e-4.
    """
    d = w1.shape[0]
    w_eff = (w1 @ w2).reshape(1, d).astype(jnp.float32)        # (1, D_obs)
    b_eff = (b1 @ w2 + b2).reshape(1, 1).astype(jnp.float32)   # (1, 1)
    return w_eff, b_eff


def critic_forward(x, w_eff, b_eff, *, block_rows=8192):
    """values = x @ w_eff.T + b_eff, tiled over the batch on a 1-D grid.

    x:     (B, D_obs) float32
    w_eff: (1, D_obs) float32 folded weight (see fold_critic_params)
    b_eff: (1, 1)     float32 folded bias
    Returns values of shape (B, 1) float32.
    """
    B, D = x.shape

    # Batch tile: multiple of 8 sublanes (f32).  8192 rows = 1.5 MiB of x per
    # buffer, so per-grid-step overhead is <~25% of the tile DMA on v6e and the
    # double-buffered working set (x tiles + lane-padded out tiles) stays well
    # under the scoped-VMEM limit on every generation.
    tb = max(8, min(block_rows, _round_up(B, 8)))
    # Keep >=2 grid tiles for large batches so the "parallel" grid axis can
    # shard the batch across both TensorCores on v7x (no-op on v5e/v6e).
    if B > 2048 and pl.cdiv(B, tb) < 2:
        tb = _round_up(pl.cdiv(B, 2), 8)
    num_tiles = pl.cdiv(B, tb)

    # No jnp.pad and no trailing slice: Pallas masks the ragged last block's
    # writeback itself; padded rows only ever feed a per-row reduce.
    return pl.pallas_call(
        _critic_kernel,
        out_shape=jax.ShapeDtypeStruct((B, 1), jnp.float32),
        grid=(num_tiles,),
        in_specs=[
            pl.BlockSpec((tb, D), lambda i: (i, 0)),             # x tile
            pl.BlockSpec((1, D), lambda i: (0, 0)),              # W_eff resident
            pl.BlockSpec(memory_space=pltpu.MemorySpace.SMEM),   # b_eff scalar
        ],
        out_specs=pl.BlockSpec((tb, 1), lambda i: (i, 0)),
        compiler_params=pltpu.CompilerParams(
            dimension_semantics=("parallel",),   # shards batch across TCs (v7x)
            vmem_limit_bytes=32 * 1024 * 1024,
        ),
    )(x, w_eff, b_eff)


def init_params(key, obs_dim, hidden_size):
    """Xavier-uniform weights, zero biases (matches init_(...) in the spec)."""
    k1, k2 = jax.random.split(key)
    lim1 = (6.0 / (obs_dim + hidden_size)) ** 0.5
    lim2 = (6.0 / (hidden_size + 1)) ** 0.5
    # Stored as (D_in, D_out), i.e. the transpose of torch's Linear.weight.
    w1 = jax.random.uniform(k1, (obs_dim, hidden_size), jnp.float32, -lim1, lim1)
    b1 = jnp.zeros((1, hidden_size), jnp.float32)
    w2 = jax.random.uniform(k2, (hidden_size, 1), jnp.float32, -lim2, lim2)
    b2 = jnp.zeros((1, 1), jnp.float32)
    return w1, b1, w2, b2


if __name__ == "__main__":
    # Shapes consistent with the module: train_share_observation_shape=(48,),
    # args.hidden_size=32, batch of flattened (rollout*agents) features = 8.
    B, OBS_DIM, HIDDEN = 8, 48, 32

    key = jax.random.PRNGKey(0)
    k_x, k_x2, k_p = jax.random.split(key, 3)
    critic_features = jax.random.normal(k_x, (B, OBS_DIM), jnp.float32)
    w1, b1, w2, b2 = init_params(k_p, OBS_DIM, HIDDEN)

    # Fold once (per parameter update), then run the jitted forward.
    w_eff, b_eff = fold_critic_params(w1, b1, w2, b2)
    forward = jax.jit(critic_forward, static_argnames=("block_rows",))

    values = jax.block_until_ready(forward(critic_features, w_eff, b_eff))

    # Pure-JAX reference of the UNFOLDED two-layer forward (as in the module).
    ref = (critic_features @ w1 + b1) @ w2 + b2
    assert values.shape == (B, 1)
    assert jnp.allclose(values, ref, atol=1e-4, rtol=1e-4)

    # Second check: multi-tile grid with a ragged last block (1000 % 64 != 0)
    # to exercise the no-pad / edge-block-masking path at small scale.
    B2 = 1000
    x2 = jax.random.normal(k_x2, (B2, OBS_DIM), jnp.float32)
    values2 = jax.block_until_ready(forward(x2, w_eff, b_eff, block_rows=64))
    ref2 = (x2 @ w1 + b1) @ w2 + b2
    assert values2.shape == (B2, 1)
    assert jnp.allclose(values2, ref2, atol=1e-4, rtol=1e-4)

    # TODO(synk): evaluate_critic depends on an external `self.base` RNN module
    # not defined in this file; only the forward() value head is implemented.
    print("KERNEL_OK")
</pallas_src>

<mosaic_0001>
module attributes {stable_mosaic.version = 11 : i64} {
  func.func @_critic_kernel(%arg0: i32, %arg1: memref<8x48xf32, #tpu.memory_space<vmem>>, %arg2: memref<1x48xf32, #tpu.memory_space<vmem>>, %arg3: memref<1x1xf32, #tpu.memory_space<smem>>, %arg4: memref<8x1xf32, #tpu.memory_space<vmem>>) attributes {dimension_semantics = [#tpu.dimension_semantics<parallel>], iteration_bounds = array<i64: 1>, scalar_prefetch = 0 : i64, scratch_operands = 0 : i64, tpu.core_type = #tpu.core_type<tc>, window_params = [{transform_indices = @transform_0, window_bounds = array<i64: 8, 48>}, {pipeline_mode = #tpu.pipeline_mode<synchronous>, transform_indices = @transform_1, window_bounds = array<i64: 1, 48>}, {transform_indices = @transform_2, window_bounds = array<i64: 1, 1>}, {transform_indices = @transform_3, window_bounds = array<i64: 8, 1>}]} {
    %c0 = arith.constant 0 : index
    %c0_0 = arith.constant 0 : index
    %0 = vector.load %arg1[%c0, %c0_0] : memref<8x48xf32, #tpu.memory_space<vmem>>, vector<8x48xf32>
    %c0_1 = arith.constant 0 : index
    %c0_2 = arith.constant 0 : index
    %1 = vector.load %arg2[%c0_1, %c0_2] : memref<1x48xf32, #tpu.memory_space<vmem>>, vector<1x48xf32>
    %2 = vector.broadcast %1 : vector<1x48xf32> to vector<8x48xf32>
    %3 = arith.mulf %0, %2 : vector<8x48xf32>
    %cst = arith.constant dense<0.000000e+00> : vector<8xf32>
    %4 = vector.multi_reduction <add>, %3, %cst [1] : vector<8x48xf32> to vector<8xf32>
    %5 = vector.shape_cast %4 : vector<8xf32> to vector<8x1xf32>
    %c0_3 = arith.constant 0 : index
    %c0_4 = arith.constant 0 : index
    %6 = memref.load %arg3[%c0_3, %c0_4] : memref<1x1xf32, #tpu.memory_space<smem>>
    %7 = vector.broadcast %6 : f32 to vector<8x1xf32>
    %8 = arith.addf %5, %7 : vector<8x1xf32>
    %c0_5 = arith.constant 0 : index
    %c0_6 = arith.constant 0 : index
    %9 = vector.load %arg4[%c0_5, %c0_6] : memref<8x1xf32, #tpu.memory_space<vmem>>, vector<8x1xf32>
    tpu.vector_store %arg4[%c0_5, %c0_6], %8 {strides = array<i32>} : memref<8x1xf32, #tpu.memory_space<vmem>>, vector<8x1xf32>,
    return
  }
  func.func @transform_0(%arg0: i32) -> (i32, i32) {
    %c0_i32 = arith.constant 0 : i32
    %c0_i32_0 = arith.constant 0 : i32
    return %arg0, %c0_i32 : i32, i32
  }
  func.func @transform_1(%arg0: i32) -> (i32, i32) {
    %c0_i32 = arith.constant 0 : i32
    %c0_i32_0 = arith.constant 0 : i32
    %c0_i32_1 = arith.constant 0 : i32
    return %c0_i32, %c0_i32_0 : i32, i32
  }
  func.func @transform_2(%arg0: i32) -> (i32, i32) {
    %c0_i32 = arith.constant 0 : i32
    %c0_i32_0 = arith.constant 0 : i32
    %c0_i32_1 = arith.constant 0 : i32
    return %c0_i32, %c0_i32_0 : i32, i32
  }
  func.func @transform_3(%arg0: i32) -> (i32, i32) {
    %c0_i32 = arith.constant 0 : i32
    %c0_i32_0 = arith.constant 0 : i32
    return %arg0, %c0_i32 : i32, i32
  }
}

</mosaic_0001>

<bundles_post_ra>
// kernel: critic_forward.1
= control target key start
LH: loop header
LB: loop body
LE: loop exit
PB: predicated region body
PF: predicated region fallthrough
CT: control target
= control target key end

     0   :  { %9 = vsyncpa [#allocation4], 0  ;;  %s74_s12 = smov [#allocation3]   ;;  %s107_s0 = inlined_call_operand.hbm [shape: f32[8,48], index: 0, kind: input, shape index: {}]   ;;  %s108_s1 = inlined_call_operand.vmem [shape: f32[1,48], index: 1, kind: input, shape index: {}]   ;;  %s109_s2 = inlined_call_operand.<no memory space> [shape: f32[1,1], index: 2, kind: input, shape index: {}]   ;;  %s110_s3 = inlined_call_operand.vmem [shape: f32[8,1], index: 3, kind: output, shape index: {}]  }
   0x1   :  { %s16_s13 = sshll.u32 %s74_s12, 4  ;;  %s17_s13 = int_to_ptr.vmem [resolvable:$true] %s16_s13 }
   0x2   :  { %s60_s14 = scalar_lea.vmem %s17_s13, 128  ;;  %p65_p1 = scmp.lt.s32.totalorder %s17_s13, %s17_s13 }
   0x3   :  { %p61_p0 = scmp.ne.s32.totalorder %s17_s13, %s60_s14  ;;  %p66_p2 = scmp.lt.s32.totalorder %s60_s14, %s60_s14 }
   0x5   :  { %p67_p3 = por %p66_p2, %p65_p1 }
   0x7   :  { %p68_p4 = pnand %p67_p3, %p61_p0 }
   0x9   :  { %71 = shalt.err (!%p68_p4)
}
   0xa   :  { %19 = dma.hbm_to_vmem [thread:$0]  %s107_s0, 128, %s17_s13, [#allocation4]  }
   0xb   :  { %72 = dma.done.wait [#allocation4], 128  }
   0xc   :  { %73 = vsyncadd [#allocation4], 4294967168  ;;  %v27_v0 = vld [vmem:[#allocation3] sm:$0xff]  ;;  %vm36_vm0 = vcmask 392192   ;;  %v41_v4 = vstv %s109_s2  ;;  %vm43_vm1 = vcmask 7168  }
   0xd   :  { %v50_v1 = vld [vmem:[%s108_s1] ss:$0 sm:$0xff] }
   0xe   :  { %v35_v2 = vmul.f32 %v50_v1, %v27_v0 }
  0x10   :  { %v37_v3 = vsel %vm36_vm0, %v35_v2, 0.0 }
  0x11   :  { %38 = vadd.xlane.f32.xlu0 %v37_v3 }
  0x9a   :  { %v39_v5 = vpop.xlane.xlu0 %38 }
  0x9b   :  { %v42_v6 = vadd.f32 %v41_v4, %v39_v5 }
  0x9d   :  { %44 = vst.msk [vmem:[%s110_s3] sm:$0xff] %vm43_vm1, %v42_v6 }
  0x9e   :  { %49 = vsyncpa [#allocation4], 1 }

</bundles_post_ra>
